<compile_context>
chip_gen: v7x
topology: tpu7x:2x2x1
jax: 0.10.0
libtpu: 0.0.40
codegen_flags: <defaults>
</compile_context>

<pallas_src>
import jax
import jax.numpy as jnp
from jax import lax
from jax.experimental import pallas as pl
from jax.experimental.pallas import tpu as pltpu


def _round_up(n, m):
    return ((n + m - 1) // m) * m


# ----------------------------------------------------------------------------
# Kernel body.
# ----------------------------------------------------------------------------
def _fusion_kernel(x_ref, y_ref, w1x_ref, w1y_ref, b1_ref, w2d_ref, scal_ref,
                   fout_ref, fw_ref):
    x = x_ref[...]                                   # (TB, C) f32
    y = y_ref[...]                                   # (TB, C) f32

    # Linear(2C -> H) with the concat folded into split weights.
    # bf16 MXU inputs, f32 accumulation; ReLU in f32 on the VPU.
    h = (jnp.dot(x.astype(jnp.bfloat16), w1x_ref[...],
                 preferred_element_type=jnp.float32)
         + jnp.dot(y.astype(jnp.bfloat16), w1y_ref[...],
                   preferred_element_type=jnp.float32)
         + b1_ref[...])                              # (TB, H) f32
    h = jnp.maximum(h, 0.0)

    # Linear(H -> 2) collapsed to the logit difference, lane-padded to 128
    # output columns (only column 0 non-zero), bf16 MXU inputs.
    d = jnp.dot(h.astype(jnp.bfloat16), w2d_ref[...],
                preferred_element_type=jnp.float32)  # (TB, 128)

    temp = scal_ref[0]                               # temperature (SMEM scalar)
    b2d = scal_ref[1]                                # b2[0] - b2[1] (SMEM scalar)
    z = (d[:, 0:1] + b2d) * temp                     # (TB, 1)

    # softmax over two logits == sigmoid of the scaled difference (exact).
    w_x = 1.0 / (1.0 + jnp.exp(-z))                  # weight on x, (TB, 1)
    w_y = 1.0 - w_x                                  # weight on y

    # Fused feature (all-f32 VPU blend).
    fout_ref[...] = w_x * x + w_y * y

    # Lane-dense f_weight block: col 0 = w_x, col 1 = w_y, rest 0.
    lanes = lax.broadcasted_iota(jnp.int32, fw_ref.shape, 1)
    fw_ref[...] = jnp.where(lanes == 0, w_x, jnp.where(lanes == 1, w_y, 0.0))


# ----------------------------------------------------------------------------
# pallas_call builder.
# ----------------------------------------------------------------------------
def _build_fusion_call(Bp, C, H, TB, vmem_limit_bytes, cost,
                       single_buffer_weights):
    w_kwargs = {}
    if single_buffer_weights:
        # Constant index_map -> fetched once; a single VMEM buffer suffices.
        w_kwargs = dict(pipeline_mode=pl.Buffered(1))

    def const(shape, **kw):
        return pl.BlockSpec(shape, lambda i: tuple(0 for _ in shape), **kw)

    def batched(shape):
        return pl.BlockSpec(shape, lambda i: (i, 0))

    return pl.pallas_call(
        _fusion_kernel,
        out_shape=(
            jax.ShapeDtypeStruct((Bp, C), jnp.float32),    # f_out
            jax.ShapeDtypeStruct((Bp, 128), jnp.float32),  # f_weight (lane-padded)
        ),
        grid=(Bp // TB,),
        in_specs=[
            batched((TB, C)),                                   # x
            batched((TB, C)),                                   # y
            const((C, H), **w_kwargs),                          # W1 top half  (bf16)
            const((C, H), **w_kwargs),                          # W1 bottom half (bf16)
            const((1, H), **w_kwargs),                          # b1 (f32)
            const((H, 128), **w_kwargs),                        # W2 diff, lane-padded (bf16)
            pl.BlockSpec(memory_space=pltpu.MemorySpace.SMEM),  # [temperature, b2 diff]
        ],
        out_specs=(
            batched((TB, C)),       # f_out
            batched((TB, 128)),     # f_weight (lane-padded)
        ),
        compiler_params=pltpu.CompilerParams(
            dimension_semantics=("parallel",),
            vmem_limit_bytes=vmem_limit_bytes),
        cost_estimate=cost,
    )


# ----------------------------------------------------------------------------
# Device / tiling helpers.
# ----------------------------------------------------------------------------
def _vmem_capacity_bytes():
    """Physical per-core VMEM; conservative 128 MiB fallback if unqueryable."""
    default = 128 << 20
    try:
        info = pltpu.get_tpu_info()
    except Exception:
        return default
    cap = getattr(info, "vmem_capacity_bytes", None)
    try:
        cap = int(cap)
    except (TypeError, ValueError):
        return default
    return cap if cap > 0 else default


def _pick_block_b(B, block_b, vmem_cap):
    """Per-generation batch tile: 512 on 128-MiB chips, 128 on 64-MiB chips,
    shrunk so the parallel grid has enough steps to feed all TensorCores."""
    small_vmem = vmem_cap <= (64 << 20) + (1 << 20)     # v7x-class
    if block_b is None:
        block_b = 128 if small_vmem else 512
    tb = _round_up(min(block_b, _round_up(B, 8)), 8)
    min_steps = 4 if small_vmem else 2
    while pl.cdiv(B, tb) < min_steps and tb > 8:
        tb = _round_up(max(tb // 2, 8), 8)
    return tb


def _vmem_estimate(TB, C, H, weight_bufs):
    """VMEM budget including in-kernel temporaries."""
    w1 = weight_bufs * 2 * C * H * 2                    # bf16 W1 halves
    consts = weight_bufs * (H * 4 + H * 128 * 2)        # b1 f32 + w2d bf16
    io = (2 * (2 * TB * C * 4)                          # x, y (double-buffered)
          + 2 * (TB * C * 4 + TB * 128 * 4))            # f_out, f_w (double-buffered)
    tmps = (2 * TB * C * 2                              # x/y bf16 casts
            + TB * H * 4 + TB * H * 2                   # h f32 + h bf16
            + TB * 128 * 4                              # d
            + 4 * TB * C)                               # blend temporaries
    return w1 + consts + io + tmps + (1 << 10)


# ----------------------------------------------------------------------------
# One-time parameter preparation (hoisted out of the per-call path).
# ----------------------------------------------------------------------------
def prepare_fusion_params(w1x, w1y, b1, w2, b2, temperature):
    """Transform raw parameters once: bf16 W1 halves, f32 b1 row, collapsed
    lane-padded bf16 W2 difference, and the SMEM scalar vector."""
    H = w1x.shape[1]
    w1x_bf = jnp.asarray(w1x, jnp.bfloat16)
    w1y_bf = jnp.asarray(w1y, jnp.bfloat16)
    b1_f32 = jnp.reshape(jnp.asarray(b1, jnp.float32), (1, H))
    w2_f32 = jnp.asarray(w2, jnp.float32)
    w2d = w2_f32[:, 0] - w2_f32[:, 1]                               # (H,)
    w2d_pad = (jnp.zeros((H, 128), jnp.bfloat16)
               .at[:, 0].set(w2d.astype(jnp.bfloat16)))             # lane-dense
    b2_f32 = jnp.reshape(jnp.asarray(b2, jnp.float32), (-1,))
    scalars = jnp.concatenate([
        jnp.reshape(jnp.asarray(temperature, jnp.float32), (1,)),
        jnp.reshape(b2_f32[0] - b2_f32[1], (1,)),
    ])
    return w1x_bf, w1y_bf, b1_f32, w2d_pad, scalars


# ----------------------------------------------------------------------------
# Public wrapper mirroring TempSoftmaxFusion.forward.
# ----------------------------------------------------------------------------
def temp_softmax_fusion(x, y, prepared, work=True, block_b=None):
    """x, y: (B, C) float32; prepared = prepare_fusion_params(...).
    Returns (x_out, y_out, f_weight) like the PyTorch module."""
    if not work:
        return x, y, None

    w1x_bf, w1y_bf, b1_f32, w2d_pad, scalars = prepared
    x = jnp.asarray(x, jnp.float32)
    y = jnp.asarray(y, jnp.float32)
    B, C = x.shape
    H = w1x_bf.shape[1]

    vmem_cap = _vmem_capacity_bytes()
    TB = _pick_block_b(B, block_b, vmem_cap)
    Bp = _round_up(B, TB)
    if Bp != B:
        x_p = jnp.pad(x, ((0, Bp - B), (0, 0)))
        y_p = jnp.pad(y, ((0, Bp - B), (0, 0)))
    else:
        x_p, y_p = x, y

    # Single-buffer the constant-index_map weights iff the API exists; the
    # VMEM budget is computed for whichever configuration is actually built.
    single_buffer = hasattr(pl, "Buffered")
    weight_bufs = 1 if single_buffer else 2
    vmem_est = _vmem_estimate(TB, C, H, weight_bufs)
    cap_limit = int(0.85 * vmem_cap)
    vmem_limit = min(vmem_est * 3 // 2 + (4 << 20), cap_limit)
    vmem_limit = int(max(vmem_limit, min(32 << 20, cap_limit)))

    cost = pl.CostEstimate(
        flops=int(4 * Bp * C * H + 2 * Bp * H * 128 + 10 * Bp * C),
        transcendentals=int(Bp),
        bytes_accessed=int(3 * Bp * C * 4 + Bp * 128 * 4
                           + 2 * C * H * 2 + H * 4 + H * 128 * 2 + 8),
    )

    call = _build_fusion_call(Bp, C, H, TB, vmem_limit, cost, single_buffer)
    f_out_p, f_w_p = call(x_p, y_p, w1x_bf, w1y_bf, b1_f32, w2d_pad, scalars)

    f_out = f_out_p[:B]
    f_weight = f_w_p[:B, :2]
    # x_out and y_out are both the fused feature, per the module.
    return f_out, f_out, f_weight


# ----------------------------------------------------------------------------
# Synthetic parameters + pure-JAX reference.
# ----------------------------------------------------------------------------
def init_params(key, C, H):
    """Deterministic synthetic parameters (shapes follow the module __init__)."""
    k1, k2, k3, k4 = jax.random.split(key, 4)
    # Linear(2C -> H): torch weight is (H, 2C); stored transposed & split here.
    lim1 = 1.0 / jnp.sqrt(2.0 * C)
    w1 = jax.random.uniform(k1, (2 * C, H), jnp.float32, -lim1, lim1)
    b1 = jax.random.uniform(k2, (1, H), jnp.float32, -lim1, lim1)
    w1x, w1y = w1[:C], w1[C:]
    # Linear(H -> 2)
    lim2 = 1.0 / jnp.sqrt(1.0 * H)
    w2 = jax.random.uniform(k3, (H, 2), jnp.float32, -lim2, lim2)
    b2 = jax.random.uniform(k4, (1, 2), jnp.float32, -lim2, lim2)
    temperature = jnp.ones((1,), jnp.float32)
    return w1x, w1y, b1, w2, b2, temperature


def _reference(x, y, params):
    """Pure-JAX reference mirroring the kernel's precision choices."""
    w1x, w1y, b1, w2, b2, t = params
    h = (jnp.dot(x.astype(jnp.bfloat16), w1x.astype(jnp.bfloat16),
                 preferred_element_type=jnp.float32)
         + jnp.dot(y.astype(jnp.bfloat16), w1y.astype(jnp.bfloat16),
                   preferred_element_type=jnp.float32)
         + jnp.reshape(b1, (1, -1)))
    h = jnp.maximum(h, 0.0)
    f_temp = (jnp.dot(h.astype(jnp.bfloat16), w2.astype(jnp.bfloat16),
                      preferred_element_type=jnp.float32)
              + jnp.reshape(b2, (1, 2)))
    f_w = jax.nn.softmax(f_temp * t[0], axis=1)
    f_out = f_w[:, 0:1] * x + f_w[:, 1:2] * y
    return f_out, f_w


if __name__ == "__main__":
    key = jax.random.PRNGKey(0)
    kx, ky, kp = jax.random.split(key, 3)

    # Small shapes consistent with the module: x, y are (B, C); MLP is [2C, H, 2].
    B, C, H = 48, 128, 256
    x = jax.random.normal(kx, (B, C), jnp.float32)
    y = jax.random.normal(ky, (B, C), jnp.float32)
    raw_params = init_params(kp, C, H)
    prepared = prepare_fusion_params(*raw_params)   # one-time transform

    # Explicit block_b=32 -> grid of 2+ steps plus batch padding (exercises the
    # pipeline and the padded-row slicing).
    x_out, y_out, f_weight = temp_softmax_fusion(x, y, prepared, work=True,
                                                 block_b=32)
    jax.block_until_ready((x_out, y_out, f_weight))

    # Sanity checks against the pure-JAX reference.
    ref_out, ref_w = _reference(x, y, raw_params)
    assert x_out.shape == (B, C) and f_weight.shape == (B, 2)
    assert jnp.allclose(x_out, ref_out, atol=2e-2, rtol=2e-2)
    assert jnp.allclose(y_out, ref_out, atol=2e-2, rtol=2e-2)
    assert jnp.allclose(f_weight, ref_w, atol=2e-2, rtol=2e-2)
    assert jnp.allclose(jnp.sum(f_weight, axis=1), 1.0, atol=1e-5)

    # Device-tuned default tile pick (v6e->512-cap, v7x->128-cap, clamped to B).
    x_out2, _, f_weight2 = temp_softmax_fusion(x, y, prepared, work=True)
    jax.block_until_ready((x_out2, f_weight2))
    assert jnp.allclose(x_out2, ref_out, atol=2e-2, rtol=2e-2)
    assert jnp.allclose(f_weight2, ref_w, atol=2e-2, rtol=2e-2)

    # work=False path (identity passthrough, no kernel).
    xo, yo, fw = temp_softmax_fusion(x, y, prepared, work=False)
    assert fw is None and xo is x and yo is y

    print("KERNEL_OK")
</pallas_src>

<mosaic_0001>
module attributes {stable_mosaic.version = 11 : i64} {
  func.func @_fusion_kernel(%arg0: i32, %arg1: memref<32x128xf32, #tpu.memory_space<vmem>>, %arg2: memref<32x128xf32, #tpu.memory_space<vmem>>, %arg3: memref<128x256xbf16, #tpu.memory_space<vmem>>, %arg4: memref<128x256xbf16, #tpu.memory_space<vmem>>, %arg5: memref<1x256xf32, #tpu.memory_space<vmem>>, %arg6: memref<256x128xbf16, #tpu.memory_space<vmem>>, %arg7: memref<2xf32, #tpu.memory_space<smem>>, %arg8: memref<32x128xf32, #tpu.memory_space<vmem>>, %arg9: memref<32x128xf32, #tpu.memory_space<vmem>>) attributes {dimension_semantics = [#tpu.dimension_semantics<parallel>], iteration_bounds = array<i64: 2>, scalar_prefetch = 0 : i64, scratch_operands = 0 : i64, tpu.core_type = #tpu.core_type<tc>, window_params = [{transform_indices = @transform_0, window_bounds = array<i64: 32, 128>}, {transform_indices = @transform_1, window_bounds = array<i64: 32, 128>}, {pipeline_mode = #tpu.pipeline_mode<synchronous>, transform_indices = @transform_2, window_bounds = array<i64: 128, 256>}, {pipeline_mode = #tpu.pipeline_mode<synchronous>, transform_indices = @transform_3, window_bounds = array<i64: 128, 256>}, {pipeline_mode = #tpu.pipeline_mode<synchronous>, transform_indices = @transform_4, window_bounds = array<i64: 1, 256>}, {pipeline_mode = #tpu.pipeline_mode<synchronous>, transform_indices = @transform_5, window_bounds = array<i64: 256, 128>}, {transform_indices = @transform_6, window_bounds = array<i64: 2>}, {transform_indices = @transform_7, window_bounds = array<i64: 32, 128>}, {transform_indices = @transform_8, window_bounds = array<i64: 32, 128>}]} {
    %c0 = arith.constant 0 : index
    %c0_0 = arith.constant 0 : index
    %0 = vector.load %arg1[%c0, %c0_0] : memref<32x128xf32, #tpu.memory_space<vmem>>, vector<32x128xf32>
    %c0_1 = arith.constant 0 : index
    %c0_2 = arith.constant 0 : index
    %1 = vector.load %arg2[%c0_1, %c0_2] : memref<32x128xf32, #tpu.memory_space<vmem>>, vector<32x128xf32>
    %2 = arith.truncf %0 : vector<32x128xf32> to vector<32x128xbf16>
    %c0_3 = arith.constant 0 : index
    %c0_4 = arith.constant 0 : index
    %3 = vector.load %arg3[%c0_3, %c0_4] : memref<128x256xbf16, #tpu.memory_space<vmem>>, vector<128x256xbf16>
    %cst = arith.constant dense<0.000000e+00> : vector<32x256xf32>
    %4 = tpu.matmul %2, %3, %cst {dimension_numbers = #tpu.dot_dimension_numbers<[1], [0], [0], [1], [0, 0, 1, 1], [], []>} : vector<32x128xbf16>, vector<128x256xbf16>, vector<32x256xf32> -> vector<32x256xf32>
    %5 = arith.truncf %1 : vector<32x128xf32> to vector<32x128xbf16>
    %c0_5 = arith.constant 0 : index
    %c0_6 = arith.constant 0 : index
    %6 = vector.load %arg4[%c0_5, %c0_6] : memref<128x256xbf16, #tpu.memory_space<vmem>>, vector<128x256xbf16>
    %cst_7 = arith.constant dense<0.000000e+00> : vector<32x256xf32>
    %7 = tpu.matmul %5, %6, %cst_7 {dimension_numbers = #tpu.dot_dimension_numbers<[1], [0], [0], [1], [0, 0, 1, 1], [], []>} : vector<32x128xbf16>, vector<128x256xbf16>, vector<32x256xf32> -> vector<32x256xf32>
    %8 = arith.addf %4, %7 : vector<32x256xf32>
    %c0_8 = arith.constant 0 : index
    %c0_9 = arith.constant 0 : index
    %9 = vector.load %arg5[%c0_8, %c0_9] : memref<1x256xf32, #tpu.memory_space<vmem>>, vector<1x256xf32>
    %10 = vector.broadcast %9 : vector<1x256xf32> to vector<32x256xf32>
    %11 = arith.addf %8, %10 : vector<32x256xf32>
    %cst_10 = arith.constant 0.000000e+00 : f32
    %12 = vector.broadcast %cst_10 : f32 to vector<32x256xf32>
    %13 = arith.maximumf %11, %12 : vector<32x256xf32>
    %14 = arith.truncf %13 : vector<32x256xf32> to vector<32x256xbf16>
    %c0_11 = arith.constant 0 : index
    %c0_12 = arith.constant 0 : index
    %15 = vector.load %arg6[%c0_11, %c0_12] : memref<256x128xbf16, #tpu.memory_space<vmem>>, vector<256x128xbf16>
    %cst_13 = arith.constant dense<0.000000e+00> : vector<32x128xf32>
    %16 = tpu.matmul %14, %15, %cst_13 {dimension_numbers = #tpu.dot_dimension_numbers<[1], [0], [0], [1], [0, 0, 1, 1], [], []>} : vector<32x256xbf16>, vector<256x128xbf16>, vector<32x128xf32> -> vector<32x128xf32>
    %c0_14 = arith.constant 0 : index
    %17 = memref.load %arg7[%c0_14] : memref<2xf32, #tpu.memory_space<smem>>
    %c1 = arith.constant 1 : index
    %18 = memref.load %arg7[%c1] : memref<2xf32, #tpu.memory_space<smem>>
    %19 = vector.extract_strided_slice %16 {offsets = [0, 0], sizes = [32, 1], strides = [1, 1]} : vector<32x128xf32> to vector<32x1xf32>
    %20 = vector.broadcast %18 : f32 to vector<32x1xf32>
    %21 = arith.addf %19, %20 : vector<32x1xf32>
    %22 = vector.broadcast %17 : f32 to vector<32x1xf32>
    %23 = arith.mulf %21, %22 : vector<32x1xf32>
    %cst_15 = arith.constant 0.000000e+00 : f32
    %24 = vector.broadcast %cst_15 : f32 to vector<32x1xf32>
    %25 = arith.subf %24, %23 : vector<32x1xf32>
    %26 = math.exp %25 : vector<32x1xf32>
    %cst_16 = arith.constant 1.000000e+00 : f32
    %27 = vector.broadcast %cst_16 : f32 to vector<32x1xf32>
    %28 = arith.addf %27, %26 : vector<32x1xf32>
    %cst_17 = arith.constant 1.000000e+00 : f32
    %29 = vector.broadcast %cst_17 : f32 to vector<32x1xf32>
    %30 = arith.divf %29, %28 : vector<32x1xf32>
    %cst_18 = arith.constant 1.000000e+00 : f32
    %31 = vector.broadcast %cst_18 : f32 to vector<32x1xf32>
    %32 = arith.subf %31, %30 : vector<32x1xf32>
    %33 = vector.broadcast %30 : vector<32x1xf32> to vector<32x128xf32>
    %34 = arith.mulf %33, %0 : vector<32x128xf32>
    %35 = vector.broadcast %32 : vector<32x1xf32> to vector<32x128xf32>
    %36 = arith.mulf %35, %1 : vector<32x128xf32>
    %37 = arith.addf %34, %36 : vector<32x128xf32>
    %c0_19 = arith.constant 0 : index
    %c0_20 = arith.constant 0 : index
    %38 = vector.load %arg8[%c0_19, %c0_20] : memref<32x128xf32, #tpu.memory_space<vmem>>, vector<32x128xf32>
    tpu.vector_store %arg8[%c0_19, %c0_20], %37 {strides = array<i32>} : memref<32x128xf32, #tpu.memory_space<vmem>>, vector<32x128xf32>,
    %39 = tpu.iota {dimensions = array<i32: 1>} : vector<32x128xi32>
    %c0_i32 = arith.constant 0 : i32
    %40 = vector.broadcast %c0_i32 : i32 to vector<32x128xi32>
    %41 = arith.cmpi eq, %39, %40 : vector<32x128xi32>
    %c1_i32 = arith.constant 1 : i32
    %42 = vector.broadcast %c1_i32 : i32 to vector<32x128xi32>
    %43 = arith.cmpi eq, %39, %42 : vector<32x128xi32>
    %cst_21 = arith.constant 0.000000e+00 : f32
    %44 = vector.shape_cast %32 : vector<32x1xf32> to vector<32x1xf32>
    %45 = vector.broadcast %44 : vector<32x1xf32> to vector<32x128xf32>
    %46 = vector.broadcast %cst_21 : f32 to vector<32x128xf32>
    %47 = arith.select %43, %45, %46 : vector<32x128xi1>, vector<32x128xf32>
    %48 = vector.shape_cast %30 : vector<32x1xf32> to vector<32x1xf32>
    %49 = vector.broadcast %48 : vector<32x1xf32> to vector<32x128xf32>
    %50 = arith.select %41, %49, %47 : vector<32x128xi1>, vector<32x128xf32>
    %c0_22 = arith.constant 0 : index
    %c0_23 = arith.constant 0 : index
    %51 = vector.load %arg9[%c0_22, %c0_23] : memref<32x128xf32, #tpu.memory_space<vmem>>, vector<32x128xf32>
    tpu.vector_store %arg9[%c0_22, %c0_23], %50 {strides = array<i32>} : memref<32x128xf32, #tpu.memory_space<vmem>>, vector<32x128xf32>,
    return
  }
  func.func @transform_0(%arg0: i32) -> (i32, i32) {
    %c0_i32 = arith.constant 0 : i32
    %c0_i32_0 = arith.constant 0 : i32
    return %arg0, %c0_i32 : i32, i32
  }
  func.func @transform_1(%arg0: i32) -> (i32, i32) {
    %c0_i32 = arith.constant 0 : i32
    %c0_i32_0 = arith.constant 0 : i32
    return %arg0, %c0_i32 : i32, i32
  }
  func.func @transform_2(%arg0: i32) -> (i32, i32) {
    %c0_i32 = arith.constant 0 : i32
    %c0_i32_0 = arith.constant 0 : i32
    %c0_i32_1 = arith.constant 0 : i32
    return %c0_i32, %c0_i32_0 : i32, i32
  }
  func.func @transform_3(%arg0: i32) -> (i32, i32) {
    %c0_i32 = arith.constant 0 : i32
    %c0_i32_0 = arith.constant 0 : i32
    %c0_i32_1 = arith.constant 0 : i32
    return %c0_i32, %c0_i32_0 : i32, i32
  }
  func.func @transform_4(%arg0: i32) -> (i32, i32) {
    %c0_i32 = arith.constant 0 : i32
    %c0_i32_0 = arith.constant 0 : i32
    %c0_i32_1 = arith.constant 0 : i32
    return %c0_i32, %c0_i32_0 : i32, i32
  }
  func.func @transform_5(%arg0: i32) -> (i32, i32) {
    %c0_i32 = arith.constant 0 : i32
    %c0_i32_0 = arith.constant 0 : i32
    %c0_i32_1 = arith.constant 0 : i32
    return %c0_i32, %c0_i32_0 : i32, i32
  }
  func.func @transform_6(%arg0: i32) -> i32 {
    %c0_i32 = arith.constant 0 : i32
    %c0_i32_0 = arith.constant 0 : i32
    return %c0_i32 : i32
  }
  func.func @transform_7(%arg0: i32) -> (i32, i32) {
    %c0_i32 = arith.constant 0 : i32
    %c0_i32_0 = arith.constant 0 : i32
    return %arg0, %c0_i32 : i32, i32
  }
  func.func @transform_8(%arg0: i32) -> (i32, i32) {
    %c0_i32 = arith.constant 0 : i32
    %c0_i32_0 = arith.constant 0 : i32
    return %arg0, %c0_i32 : i32, i32
  }
}

</mosaic_0001>

<bundles_post_ra>
// kernel: tpu_custom_call.1
= control target key start
LH: loop header
LB: loop body
LE: loop exit
PB: predicated region body
PF: predicated region fallthrough
CT: control target
= control target key end

     0   :  { %s2355_s0 = inlined_call_operand.hbm [shape: f32[64,128], index: 0, kind: input, shape index: {}]   ;;  %s2356_s1 = inlined_call_operand.hbm [shape: f32[64,128], index: 1, kind: input, shape index: {}]   ;;  %s2357_s2 = inlined_call_operand.hbm [shape: bf16[128,256], index: 2, kind: input, shape index: {}]   ;;  %s2358_s3 = inlined_call_operand.hbm [shape: bf16[128,256], index: 3, kind: input, shape index: {}]   ;;  %s2359_s4 = inlined_call_operand.vmem [shape: f32[1,256], index: 4, kind: input, shape index: {}]   ;;  %s2360_s5 = inlined_call_operand.hbm [shape: bf16[256,128], index: 5, kind: input, shape index: {}]   ;;  %s2361_s6 = inlined_call_operand.vmem [shape: f32[2], index: 6, kind: input, shape index: {}]   ;;  %s2362_s7 = inlined_call_operand.hbm [shape: f32[64,128], index: 7, kind: output, shape index: {0}]   ;;  %s2363_s8 = inlined_call_operand.hbm [shape: f32[64,128], index: 8, kind: output, shape index: {1}]  }
   0x1   :  { %2373 = sst [smem:[#allocation25_spill]] %s2355_s0 }
   0x2   :  { %2374 = sst [smem:[#allocation26_spill]] %s2357_s2 }
   0x3   :  { %2375 = sst [smem:[#allocation27_spill]] %s2358_s3 }
   0x4   :  { %14 = vsyncpa [#allocation3], 0 }
   0x5   :  { %16 = vsyncpa [#allocation3 + $0x1], 0 }
   0x6   :  { %17 = vsyncpa [#allocation7], 0 }
   0x7   :  { %19 = vsyncpa [#allocation7 + $0x1], 0 }
   0x8   :  { %20 = vsyncpa [#allocation10], 0 }
   0x9   :  { %21 = vsyncpa [#allocation5], 0 }
   0xa   :  { %22 = vsyncpa [#allocation4], 0 }
   0xb   :  { %24 = vsyncpa [#allocation4 + $0x1], 0 }
   0xc   :  { %25 = vsyncpa [#allocation15], 0 }
   0xd   :  { %27 = vsyncpa [#allocation15 + $0x1], 0  ;;  %s1911_s27 = smov 0   ;;  %s1913_s28 = smov 0  }
   0xe   :  { %s1915_s29 = smov 0   ;;  %s1917_s30 = smov 0  }
   0xf LB: > { %2376 = sst [smem:[#allocation23_spill]] %s1837_s27  ;;  %s1932_s9 = sadd.s32 4294967295, %s1849_s30   ;;  %s1849_s30 = sphi %s1917_s30, %s2406_s30   ;;  %s1845_s29 = sphi %s1915_s29, %s2405_s29   ;;  %s1841_s28 = sphi %s1913_s28, %s2404_s28   ;;  %s1837_s27 = sphi %s1911_s27, %s2403_s27  }
  0x10   : > { %s1271_s10 = sadd.s32 4294967294, %s1849_s30   ;;  %p53_p0 = scmp.ne.s32.totalorder %s1841_s28, %s1837_s27 }
  0x11   : > { %p2364_p1 = scmp.eq.s32.totalorder %s1932_s9, 0  ;;  %p214_p3 = scmp.eq.s32.totalorder %s1271_s10, 1 }
  0x12   : > { %p1272_p5 = scmp.ge.s32.totalorder %s1849_s30, 1  ;;  %p247_p7 = scmp.lt.s32.totalorder %s1849_s30, 3 }
  0x13   : > { %p1941_p4 = por %p2364_p1, %p53_p0  ;;  %p1946_p6 = por %p214_p3, %p53_p0 }
  0x14   : > { %p1951_p8 = pnand %p1272_p5, %p247_p7  ;;  %s1851_s14 = smov [#allocation8]  }
  0x15   : > { %s2377_s11 = scalar_select %p1941_p4, 1, 0 }
  0x16   : > { %s2378_s12 = scalar_select %p1946_p6, 1, 0 }
  0x17   : > { %s2380_s13 = scalar_select %p1951_p8, 1, 0 }
  0x18   : > { %2379 = sst [smem:[#allocation24_spill]] %s2378_s12  ;;  %s259_s15 = sshll.u32 %s1851_s14, 4  ;;  %s1955_s15 = int_to_ptr.vmem [resolvable:$true] %s259_s15 }
  0x19   : > { %p1414_p9 = pneg %p1951_p8  ;;  %s1852_s17 = smov [#allocation9]  }
  0x1a   : > { %s272_s18 = sshll.u32 %s1852_s17, 4  ;;  %s1853_s19 = smov [#allocation11]   ;;  %s1966_s18 = int_to_ptr.vmem [resolvable:$true] %s272_s18 }
  0x1b   : > { %p1962_p11 = pnand %p1414_p9, %p2364_p1  ;;  %s1968_s20 = sshll.u32 %s1853_s19, 4  ;;  %s289_s20 = int_to_ptr.vmem [resolvable:$true] %s1968_s20 }
  0x1c   : > { %s2382_s2 = sld [smem:[#allocation26_spill]] }
  0x1d   : > { %p1978_p13 = pneg %p1962_p11 }
  0x22   : > { %s1576_s23 = scalar_lea.hbm %s2382_s2, 2048 }
  0x23   : > { %p1577_p12 = scmp.ne.s32.totalorder %s2382_s2, %s1576_s23  ;;  %p1583_p5 = scmp.lt.u32.totalorder %s1576_s23, %s2382_s2 }
  0x25   : > { %p1579_p0 = pnand %p1978_p13, %p1577_p12 }
  0x27   : > { %p1580_p3 = pneg %p1579_p0 }
  0x29   : > { %p1585_p7 = pnand %p1583_p5, %p1580_p3 }
  0x2b   : > { %1588 = shalt.err (!%p1585_p7)
}
  0x2c   : > { %s1589_s17 = scalar_lea.vmem %s1955_s15, 2048  ;;  %p1597_p2 = scmp.lt.s32.totalorder %s1955_s15, %s1955_s15 }
  0x2d   : > { %p1590_p9 = scmp.ne.s32.totalorder %s1955_s15, %s1589_s17  ;;  %p1598_p6 = scmp.lt.s32.totalorder %s1589_s17, %s1589_s17 }
  0x2f   : > { %p1592_p10 = pnand %p1590_p9, %p1978_p13  ;;  %p1599_p12 = por %p1598_p6, %p1597_p2 }
  0x31   : > { %p1593_p1 = pneg %p1592_p10 }
  0x33   : > { %p1600_p0 = pnand %p1599_p12, %p1593_p1 }
  0x35   : > { %1603 = shalt.err (!%p1600_p0)
}
  0x36   : > { %s2369_s19 = smov 128   ;;  %s2371_s21 = smov 8  }
  0x37   : > { %1417 = dma.hbm_to_vmem [thread:$0]  (!%p1962_p11), %s2382_s2, 2048, %s1955_s15, [#allocation7], %s2369_s19, %s2369_s19, %s2371_s21  }
  0x38   : > { %s2384_s3 = sld [smem:[#allocation27_spill]] }
  0x3e   : > { %s1604_s10 = scalar_lea.hbm %s2384_s3, 2048 }
  0x3f   : > { %p1605_p1 = scmp.ne.s32.totalorder %s2384_s3, %s1604_s10  ;;  %p1611_p10 = scmp.lt.u32.totalorder %s1604_s10, %s2384_s3 }
  0x41   : > { %p1607_p2 = pnand %p1605_p1, %p1978_p13 }
  0x43   : > { %p1608_p6 = pneg %p1607_p2 }
  0x45   : > { %p1613_p3 = pnand %p1611_p10, %p1608_p6 }
  0x47   : > { %1616 = shalt.err (!%p1613_p3)
}
  0x48   : > { %s1617_s15 = scalar_lea.vmem %s1966_s18, 2048  ;;  %p1625_p12 = scmp.lt.s32.totalorder %s1966_s18, %s1966_s18 }
  0x49   : > { %p1618_p5 = scmp.ne.s32.totalorder %s1966_s18, %s1617_s15  ;;  %p1626_p0 = scmp.lt.s32.totalorder %s1617_s15, %s1617_s15 }
  0x4b   : > { %p1620_p7 = pnand %p1618_p5, %p1978_p13  ;;  %p1627_p1 = por %p1626_p0, %p1625_p12 }
  0x4d   : > { %p1621_p9 = pneg %p1620_p7 }
  0x4f   : > { %p1628_p2 = pnand %p1627_p1, %p1621_p9 }
  0x51   : > { %1631 = shalt.err (!%p1628_p2)
}
  0x52   : > { %1420 = dma.hbm_to_vmem [thread:$0]  (!%p1962_p11), %s2384_s3, 2048, %s1966_s18, [#allocation10], %s2369_s19, %s2369_s19, %s2371_s21  }
  0x53   : > { %s302_s24 = sshll.u32 %s2361_s6, 4  ;;  %s1632_s14 = scalar_lea.hbm %s2360_s5, 2048  ;;  %s303_s24 = int_to_ptr.vmem [resolvable:$true] %s302_s24 }
  0x54   : > { %p1633_p6 = scmp.ne.s32.totalorder %s2360_s5, %s1632_s14  ;;  %p1639_p5 = scmp.lt.u32.totalorder %s1632_s14, %s2360_s5 }
  0x56   : > { %p1635_p10 = pnand %p1633_p6, %p1978_p13 }
  0x58   : > { %p1636_p3 = pneg %p1635_p10 }
  0x5a   : > { %p1641_p7 = pnand %p1639_p5, %p1636_p3 }
  0x5c   : > { %1644 = shalt.err (!%p1641_p7)
}
  0x5d   : > { %s1645_s18 = scalar_lea.vmem %s289_s20, 2048  ;;  %p1653_p1 = scmp.lt.s32.totalorder %s289_s20, %s289_s20 }
  0x5e   : > { %p1646_p9 = scmp.ne.s32.totalorder %s289_s20, %s1645_s18  ;;  %p1654_p2 = scmp.lt.s32.totalorder %s1645_s18, %s1645_s18 }
  0x60   : > { %p1648_p12 = pnand %p1646_p9, %p1978_p13  ;;  %p1655_p4 = por %p1654_p2, %p1653_p1 }
  0x62   : > { %p1649_p0 = pneg %p1648_p12 }
  0x64   : > { %p1656_p8 = pnand %p1655_p4, %p1649_p0 }
  0x66   : > { %1659 = shalt.err (!%p1656_p8)
}
  0x67   : > { %s1856_s22 = smov 64   ;;  %s1857_s23 = smov 4  }
  0x68   : > { %1423 = dma.hbm_to_vmem [thread:$0]  (!%p1962_p11), %s2360_s5, 2048, %s289_s20, [#allocation10], %s1856_s22, %s1856_s22, %s1857_s23  }
  0x69   : > { %s1660_s14 = scalar_lea.vmem %s303_s24, 16  ;;  %p1668_p5 = scmp.lt.s32.totalorder %s303_s24, %s303_s24 }
  0x6a   : > { %p1661_p6 = scmp.ne.s32.totalorder %s303_s24, %s1660_s14  ;;  %p1669_p7 = scmp.lt.s32.totalorder %s1660_s14, %s1660_s14 }
  0x6c   : > { %p1663_p10 = pnand %p1661_p6, %p1978_p13  ;;  %p1670_p9 = por %p1669_p7, %p1668_p5 }
  0x6e   : > { %p1664_p3 = pneg %p1663_p10 }
  0x70   : > { %p1671_p4 = pnand %p1670_p9, %p1664_p3 }
  0x72   : > { %1674 = shalt.err (!%p1671_p4)
}
  0x73   : > { %s1858_s17 = smov [#allocation12]   ;;  %s2055_s20 = sadd.s32 1, %s1849_s30  }
  0x74   : > { %1426 = dma.vmem_to_smem (!%p1962_p11), %s303_s24, 16, %s1858_s17, [#allocation5]  }
  0x75   : > { %s37_s26 = ssub.s32 %s1849_s30, %s2055_s20  ;;  %s40_s15 = sadd.s32 1, %s1845_s29 }
  0x76   : > { %p38_p8 = scmp.eq.s32.totalorder %s37_s26, 0  ;;  %p47_p13 = scmp.ne.s32.totalorder %s1845_s29, %s1841_s28 }
  0x77   : > { %p48_p12 = scmp.eq.s32.totalorder %s1849_s30, 0  ;;  %p2385_p1 = scmp.eq.s32.totalorder %s1932_s9, 1 }
  0x78   : > { %s2064_s16 = scalar_select %p38_p8, %s1845_s29, %s40_s15  }
  0x79   : > { %p49_p0 = por %p48_p12, %p47_p13  ;;  %p2068_p2 = por %p2385_p1, %p47_p13 }
  0x7a   : > { %p1445_p6 = scmp.lt.s32.totalorder %s1849_s30, 2  ;;  %s313_s12 = sand.u32 1, %s1845_s29  }
  0x7b   : > { %s1278_s18 = sshll.u32 %s313_s12, 5  ;;  %s1350_s24 = sshll.u32 %s1849_s30, 9 }
  0x7c   : > { %s2387_s0 = sld [smem:[#allocation25_spill]]  ;;  %s317_s10 = scalar_lea.vmem [#allocation2], %s1278_s18 }
  0x7d   : > { %s324_s14 = sshll.u32 %s317_s10, 4  ;;  %p2082_p11 = pnand %p1445_p6, %p49_p0  ;;  %s2080_s14 = int_to_ptr.vmem [resolvable:$true] %s324_s14 }
  0x7e   : > { %s2089_s22 = scalar_lea.hbm %s2356_s1, %s1350_s24  ;;  %s338_s23 = scalar_lea.vmem [#allocation6], %s1278_s18 }
  0x7f   : > { %s2091_s19 = sshll.u32 %s338_s23, 4  ;;  %s2093_s21 = scalar_lea.sflag [#allocation3], %s313_s12  ;;  %s2125_s19 = int_to_ptr.vmem [resolvable:$true] %s2091_s19 }
  0x80   : > { %p1677_p3 = pneg %p2082_p11 }
  0x82   : > { %s2078_s25 = scalar_lea.hbm %s2387_s0, %s1350_s24  ;;  %s1680_s26 = scalar_lea.hbm %s2387_s0, 1024 }
  0x83   : > { %s1675_s10 = scalar_lea.hbm %s2078_s25, 512  ;;  %p1681_p9 = scmp.lt.u32.totalorder %s2078_s25, %s2387_s0 }
  0x84   : > { %p1676_p10 = scmp.ne.s32.totalorder %s2078_s25, %s1675_s10  ;;  %p1682_p4 = scmp.lt.u32.totalorder %s1680_s26, %s1675_s10 }
  0x85   : > { %p1684_p13 = scmp.lt.u32.totalorder %s1675_s10, %s2078_s25 }
  0x86   : > { %p1678_p5 = pnand %p1677_p3, %p1676_p10  ;;  %p1683_p8 = por %p1682_p4, %p1681_p9 }
  0x88   : > { %p1679_p7 = pneg %p1678_p5  ;;  %p1685_p12 = por %p1684_p13, %p1683_p8 }
  0x8a   : > { %p1686_p0 = pnand %p1685_p12, %p1679_p7 }
  0x8c   : > { %1689 = shalt.err (!%p1686_p0)
}
  0x8d   : > { %s1690_s12 = scalar_lea.vmem %s2080_s14, 512  ;;  %s1859_s2 = smov [#allocation2]  }
  0x8e   : > { %p1691_p1 = scmp.ne.s32.totalorder %s2080_s14, %s1690_s12  ;;  %s1695_s3 = sshll.u32 %s1859_s2, 4  ;;  %s1696_s3 = int_to_ptr.vmem [resolvable:$false] %s1695_s3 }
  0x8f   : > { %s1697_s18 = scalar_lea.vmem %s1696_s3, 1024  ;;  %p1698_p5 = scmp.lt.s32.totalorder %s2080_s14, %s1696_s3 }
  0x90   : > { %p1693_p6 = pnand %p1691_p1, %p1677_p3  ;;  %p1699_p9 = scmp.lt.s32.totalorder %s1697_s18, %s1690_s12 }
  0x92   : > { %p1694_p10 = pneg %p1693_p6  ;;  %p1700_p4 = por %p1699_p9, %p1698_p5 }
  0x94   : > { %p1701_p8 = pnand %p1700_p4, %p1694_p10 }
  0x96   : > { %1704 = shalt.err (!%p1701_p8)
}
  0x97   : > { %s2389_s23 = smov 8   ;;  %s2390_s10 = smov 128  }
  0x98   : > { %1430 = dma.hbm_to_vmem [thread:$0]  (!%p2082_p11), %s2078_s25, 512, %s2080_s14, %s2093_s21, %s2390_s10, %s2390_s10, %s2389_s23  }
  0x99   : > { %s334_s26 = sand.u32 1, %s1849_s30   ;;  %s1705_s24 = scalar_lea.hbm %s2089_s22, 512 }
  0x9a   : > { %s2128_s15 = scalar_lea.sflag [#allocation7], %s334_s26  ;;  %p1706_p7 = scmp.ne.s32.totalorder %s2089_s22, %s1705_s24 }
  0x9b   : > { %s1710_s3 = scalar_lea.hbm %s2356_s1, 1024  ;;  %p1711_p0 = scmp.lt.u32.totalorder %s2089_s22, %s2356_s1 }
  0x9c   : > { %p1708_p13 = pnand %p1706_p7, %p1677_p3  ;;  %p1712_p1 = scmp.lt.u32.totalorder %s1710_s3, %s1705_s24 }
  0x9d   : > { %p1714_p10 = scmp.lt.u32.totalorder %s1705_s24, %s2089_s22 }
  0x9e   : > { %p1709_p12 = pneg %p1708_p13  ;;  %p1713_p6 = por %p1712_p1, %p1711_p0 }
  0xa0   : > { %p1715_p5 = por %p1714_p10, %p1713_p6 }
  0xa2   : > { %p1716_p9 = pnand %p1715_p5, %p1709_p12 }
  0xa4   : > { %1719 = shalt.err (!%p1716_p9)
}
  0xa5   : > { %s1720_s21 = scalar_lea.vmem %s2125_s19, 512  ;;  %s1860_s25 = smov [#allocation6]  }
  0xa6   : > { %p1721_p4 = scmp.ne.s32.totalorder %s2125_s19, %s1720_s21  ;;  %s1725_s14 = sshll.u32 %s1860_s25, 4  ;;  %s1726_s14 = int_to_ptr.vmem [resolvable:$false] %s1725_s14 }
  0xa7   : > { %s1727_s0 = scalar_lea.vmem %s1726_s14, 1024  ;;  %p1728_p13 = scmp.lt.s32.totalorder %s2125_s19, %s1726_s14 }
  0xa8   : > { %p1723_p8 = pnand %p1721_p4, %p1677_p3  ;;  %p1729_p0 = scmp.lt.s32.totalorder %s1727_s0, %s1720_s21 }
  0xaa   : > { %p1724_p7 = pneg %p1723_p8  ;;  %p1730_p1 = por %p1729_p0, %p1728_p13 }
  0xac   : > { %p1731_p6 = pnand %p1730_p1, %p1724_p7 }
  0xae   : > { %1734 = shalt.err (!%p1731_p6)
}
  0xaf   : > { %1433 = dma.hbm_to_vmem [thread:$0]  (!%p2082_p11), %s2089_s22, 512, %s2125_s19, %s2128_s15, %s2390_s10, %s2390_s10, %s2389_s23  }
  0xb0   : > { %p2391_p3 = scmp.ne.s32.totalorder %s2380_s13, 0 }
  0xb1   : > { %s2160_s26 = sand.u32 (!%p2391_p3), 1, %s1841_s28   ;;  %p2392_p12 = scmp.ne.s32.totalorder (!%p2391_p3), %s2377_s11, 0 }
  0xb2   : > { %357 = sbr.rel (%p2391_p3) target bundleno = 921 (0x399), region = 48  ;;  %s2163_s24 = sshll.u32 (!%p2391_p3), %s2160_s26, 5 }
  0xb3   : > { %s360_s17 = scalar_lea.sflag (!%p2391_p3), [#allocation3], %s2160_s26  ;;  %s2167_s12 = scalar_lea.vmem (!%p2391_p3), [#allocation2], %s2163_s24 }
  0xb9   : > { %1808 = dma.done.wait (%p2392_p12), %s360_s17, 512  }
  0xba   : > { %1810 = vsyncadd (%p2392_p12), %s360_s17, 4294966784  ;;  %s368_s13 = sand.u32 1, %s1932_s9   ;;  %s2175_s22 = scalar_lea.vmem [#allocation6], %s2163_s24 }
  0xbb   : > { %s369_s19 = scalar_lea.sflag [#allocation7], %s368_s13 }
  0xbc   : > { %1812 = dma.done.wait (%p2392_p12), %s369_s19, 512  }
  0xbd   : > { %1814 = vsyncadd (%p2392_p12), %s369_s19, 4294966784  ;;  %p2393_p11 = scmp.eq.s32.totalorder %s1932_s9, 0 }
  0xbf   : > { %1816 = dma.done.wait (%p2393_p11), [#allocation7], 2048   ;;  %p2394_p10 = pmov %p2393_p11 }
  0xc1   : > { %1818 = vsyncadd (%p2394_p10), [#allocation7], 4294965248  ;;  %p2395_p5 = pmov %p2394_p10 }
  0xc3   : > { %1820 = dma.done.wait (%p2395_p5), [#allocation10], 4096   ;;  %p2396_p9 = pmov %p2395_p5 }
  0xc4   : > { %p2397_p4 = pmov %p2395_p5 }
  0xc5   : > { %1822 = vsyncadd (%p2396_p9), [#allocation10], 4294963200 }
  0xc6   : > { %1824 = dma.done.wait (%p2397_p4), [#allocation5], 16   ;;  %p2398_p8 = pmov %p2397_p4 }
  0xc8   : > { %1826 = vsyncadd (%p2398_p8), [#allocation5], 4294967280 }
  0xc9   : > { %393 = sfence }
  0xca   : > { %v1496_v0 = vld [vmem:[#allocation9 + $0x4] ss:$8 sps:$4 sm:$0xff]   ;;  %v1498_v1 = vld [vmem:[#allocation9] ss:$8 sps:$4 sm:$0xff]   ;;  %v1861_v2 = vmov 0   ;;  %v1548_v24 = vld [vmem:[#allocation11 + $0x50] sm:$0xff]   ;;  %v749_v61 = vlaneseq }
  0xcb   : > { %593 = vmatprep.mubr.bf16.mxu0 %v1861_v2  ;;  %1494 = vset.pattern.permute.xlu0 %v1861_v2  ;;  %v1499_v3 = vld [vmem:[#allocation9 + $0x14] ss:$8 sps:$4 sm:$0xff]   ;;  %v1501_v4 = vld [vmem:[#allocation9 + $0x10] ss:$8 sps:$4 sm:$0xff]   ;;  %v1502_v5 = vld [vmem:[#allocation9 + $0x24] ss:$8 sps:$4 sm:$0xff]  }
  0xcc   : > { %561 = vmatprep.subr.bf16.mxu0 %v1496_v0  ;;  %1495 = vset.pattern.permute.xlu1 %v1861_v2  ;;  %v1504_v6 = vld [vmem:[#allocation9 + $0x20] ss:$8 sps:$4 sm:$0xff]   ;;  %v1505_v7 = vld [vmem:[#allocation9 + $0x34] ss:$8 sps:$4 sm:$0xff]   ;;  %v1507_v8 = vld [vmem:[#allocation9 + $0x30] ss:$8 sps:$4 sm:$0xff]  }
  0xcd   : > { %562 = vmatpush1.bf16.msra.mxu0 %v1498_v1  ;;  %v1508_v9 = vld [vmem:[#allocation9 + $0x44] ss:$8 sps:$4 sm:$0xff]   ;;  %v1510_v10 = vld [vmem:[#allocation9 + $0x40] ss:$8 sps:$4 sm:$0xff]   ;;  %v1511_v11 = vld [vmem:[#allocation9 + $0x54] ss:$8 sps:$4 sm:$0xff]  }
  0xce   : > { %563 = vmatprep.subr.bf16.mxu0 %v1499_v3  ;;  %v1513_v12 = vld [vmem:[#allocation9 + $0x50] ss:$8 sps:$4 sm:$0xff]   ;;  %v1514_v13 = vld [vmem:[#allocation9 + $0x64] ss:$8 sps:$4 sm:$0xff]   ;;  %v1516_v14 = vld [vmem:[#allocation9 + $0x60] ss:$8 sps:$4 sm:$0xff]  }
  0xcf   : > { %v1517_v15 = vld [vmem:[#allocation9 + $0x74] ss:$8 sps:$4 sm:$0xff]   ;;  %v1544_v16 = vld [vmem:[#allocation11 + $0x40] sm:$0xff]   ;;  %v1519_v17 = vld [vmem:[#allocation9 + $0x70] ss:$8 sps:$4 sm:$0xff]   ;;  %v750_v62 = vshrl.u32 %v749_v61, 7 }
  0xd0   : > { %v2197_v18 = vld [vmem:[%s2175_s22] sm:$0xff]  ;;  %v2200_v19 = vld [vmem:[%s2175_s22 + $0x8] sm:$0xff]  ;;  %1354 = vmatprep.subr.bf16.mxu1 %v1544_v16  ;;  %v1525_v27 = vld [vmem:[#allocation8 + $0x14] ss:$8 sps:$4 sm:$0xff]   ;;  %s1341_s10 = sld [smem:[#allocation12 + $0x1]]  ;;  %s956_s15 = sld [smem:[#allocation12]] }
  0xd1   : > { %564 = vmatpush1.bf16.msra.mxu0 %v1501_v4  ;;  %v1545_v20 = vld [vmem:[#allocation11] sm:$0xff]   ;;  %v1546_v22 = vld [vmem:[#allocation11 + $0x48] sm:$0xff]   ;;  %v463_v26 = vpack.c.bf16 %v2200_v19, %v2197_v18  ;;  %v1549_v28 = vld [vmem:[#allocation11 + $0x10] sm:$0xff]   ;;  %v751_v63 = vsub.s32 0, %v750_v62  ;;  %v755_v1 = vsub.s32 1, %v750_v62  ;;  %s2241_s2 = scalar_lea.vmem [#allocation14], %s2163_s24 }
  0xd2   : > { %565 = vmatprep.subr.bf16.mxu0 %v1502_v5  ;;  %v1522_v21 = vld [vmem:[#allocation8 + $0x4] ss:$8 sps:$4 sm:$0xff]   ;;  %1355 = vmatpush3.bf16.msra.mxu1 %v1545_v20  ;;  %v1520_v25 = vld [vmem:[#allocation8] ss:$8 sps:$4 sm:$0xff]   ;;  %v1523_v29 = vld [vmem:[#allocation8 + $0x10] ss:$8 sps:$4 sm:$0xff]  }
  0xd3   : > { %v1547_v23 = vld [vmem:[#allocation11 + $0x8] sm:$0xff]   ;;  %1356 = vmatprep.subr.bf16.mxu1 %v1546_v22  ;;  %v2205_v30 = vld [vmem:[%s2175_s22 + $0x10] sm:$0xff]  ;;  %v2208_v31 = vld [vmem:[%s2175_s22 + $0x18] sm:$0xff]  ;;  %s2246_s3 = scalar_lea.vmem [#allocation13], %s2163_s24  ;;  %s1103_s18 = sshll.u32 %s2241_s2, 4  ;;  %s2261_s18 = int_to_ptr.vmem [resolvable:$true] %s1103_s18 }
  0xd4   : > { %v1550_v32 = vld [vmem:[#allocation11 + $0x58] sm:$0xff]   ;;  %v1528_v33 = vld [vmem:[#allocation8 + $0x24] ss:$8 sps:$4 sm:$0xff]   ;;  %v464_v36 = vpack.c.bf16 %v2208_v31, %v2205_v30  ;;  %v1526_v37 = vld [vmem:[#allocation8 + $0x20] ss:$8 sps:$4 sm:$0xff]   ;;  %s1352_s21 = sshll.u32 %s1932_s9, 9 }
  0xd5   : > { %566 = vmatpush1.bf16.msra.mxu0 %v1504_v6  ;;  %v1551_v34 = vld [vmem:[#allocation11 + $0x18] sm:$0xff]   ;;  %v1552_v35 = vld [vmem:[#allocation11 + $0x60] sm:$0xff]   ;;  %v1554_v40 = vld [vmem:[#allocation11 + $0x68] sm:$0xff]   ;;  %s1087_s25 = sshll.u32 %s2246_s3, 4  ;;  %s2271_s9 = scalar_lea.hbm %s2363_s8, %s1352_s21  ;;  %s2273_s25 = int_to_ptr.vmem [resolvable:$true] %s1087_s25 }
  0xd6   : > { %567 = vmatprep.subr.bf16.mxu0 %v1505_v7  ;;  %1357 = vmatpush3.bf16.msra.mxu1 %v1547_v23  ;;  %v1531_v38 = vld [vmem:[#allocation8 + $0x34] ss:$8 sps:$4 sm:$0xff]   ;;  %v1553_v39 = vld [vmem:[#allocation11 + $0x20] sm:$0xff]   ;;  %v1529_v41 = vld [vmem:[#allocation8 + $0x30] ss:$8 sps:$4 sm:$0xff]   ;;  %s1074_s13 = scalar_lea.sflag [#allocation15], %s2160_s26 }
  0xd7   : > { %1358 = vmatprep.subr.bf16.mxu1 %v1548_v24  ;;  %v1534_v42 = vld [vmem:[#allocation8 + $0x44] ss:$8 sps:$4 sm:$0xff]   ;;  %v1532_v43 = vld [vmem:[#allocation8 + $0x40] ss:$8 sps:$4 sm:$0xff]   ;;  %v1537_v44 = vld [vmem:[#allocation8 + $0x54] ss:$8 sps:$4 sm:$0xff]  }
  0xd8   : > { %v1535_v45 = vld [vmem:[#allocation8 + $0x50] ss:$8 sps:$4 sm:$0xff]   ;;  %v1540_v46 = vld [vmem:[#allocation8 + $0x64] ss:$8 sps:$4 sm:$0xff]   ;;  %v1538_v47 = vld [vmem:[#allocation8 + $0x60] ss:$8 sps:$4 sm:$0xff]  }
  0xd9   : > { %568 = vmatpush1.bf16.msra.mxu0 %v1507_v8  ;;  %v1543_v48 = vld [vmem:[#allocation8 + $0x74] ss:$8 sps:$4 sm:$0xff]   ;;  %v1541_v49 = vld [vmem:[#allocation8 + $0x70] ss:$8 sps:$4 sm:$0xff]   ;;  %v2215_v50 = vld [vmem:[%s2167_s12] sm:$0xff]  ;;  %s1735_s19 = scalar_lea.vmem %s2261_s18, 512 }
  0xda   : > { %569 = vmatprep.subr.bf16.mxu0 %v1508_v9  ;;  %1359 = vmatpush3.bf16.msra.mxu1 %v1549_v28  ;;  %v2218_v51 = vld [vmem:[%s2167_s12 + $0x8] sm:$0xff]  ;;  %v2224_v53 = vld [vmem:[%s2167_s12 + $0x10] sm:$0xff]  ;;  %v2227_v54 = vld [vmem:[%s2167_s12 + $0x18] sm:$0xff]  ;;  %s2280_s12 = scalar_lea.hbm %s2362_s7, %s1352_s21  ;;  %p1736_p7 = scmp.ne.s32.totalorder %s2261_s18, %s1735_s19 }
  0xdb   : > { %1360 = vmatprep.subr.bf16.mxu1 %v1550_v32  ;;  %v445_v52 = vpack.c.bf16 %v2218_v51, %v2215_v50  ;;  %v446_v55 = vpack.c.bf16 %v2227_v54, %v2224_v53  ;;  %v1555_v56 = vld [vmem:[#allocation11 + $0x28] sm:$0xff]   ;;  %v1556_v57 = vld [vmem:[#allocation11 + $0x70] sm:$0xff]   ;;  %v1558_v59 = vld [vmem:[#allocation11 + $0x78] sm:$0xff]   ;;  %s1862_s22 = smov [#allocation14]  }
  0xdc   : > { %v1557_v58 = vld [vmem:[#allocation11 + $0x30] sm:$0xff]   ;;  %v1559_v60 = vld [vmem:[#allocation11 + $0x38] sm:$0xff]   ;;  %v747_v0 = vld [vmem:[%s2359_s4] sm:$0x3]  ;;  %p1737_p13 = pnand %p1736_p7, %p2068_p2  ;;  %s1739_s11 = sshll.u32 %s1862_s22, 4  ;;  %s1740_s11 = int_to_ptr.vmem [resolvable:$false] %s1739_s11 }
  0xdd   : > { %570 = vmatpush1.bf16.msra.mxu0 %v1510_v10  ;;  %v756_v3 = vrot.slane %v747_v0, %v755_v1  ;;  %s1741_s23 = scalar_lea.vmem %s1740_s11, 1024  ;;  %p1742_p1 = scmp.lt.s32.totalorder %s2261_s18, %s1740_s11 }
  0xde   : > { %571 = vmatprep.subr.bf16.mxu0 %v1511_v11  ;;  %1361 = vmatpush3.bf16.msra.mxu1 %v1551_v34  ;;  %p1738_p0 = pneg %p1737_p13  ;;  %p1743_p6 = scmp.lt.s32.totalorder %s1741_s23, %s1735_s19 }
  0xdf   : > { %1362 = vmatprep.subr.bf16.mxu1 %v1552_v35 }
  0xe0   : > { %p1744_p3 = por %p1743_p6, %p1742_p1 }
  0xe1   : > { %572 = vmatpush1.bf16.msra.mxu0 %v1513_v12 }
  0xe2   : > { %573 = vmatprep.subr.bf16.mxu0 %v1514_v13  ;;  %1363 = vmatpush3.bf16.msra.mxu1 %v1553_v39  ;;  %p1745_p12 = pnand %p1744_p3, %p1738_p0 }
  0xe3   : > { %1364 = vmatprep.subr.bf16.mxu1 %v1554_v40 }
  0xe5   : > { %574 = vmatpush1.bf16.msra.mxu0 %v1516_v14 }
  0xe6   : > { %575 = vmatprep.subr.bf16.mxu0 %v1517_v15  ;;  %1365 = vmatpush3.bf16.msra.mxu1 %v1555_v56 }
  0xe7   : > { %1366 = vmatprep.subr.bf16.mxu1 %v1556_v57 }
  0xe9   : > { %576 = vmatpush1.bf16.msra.mxu0 %v1519_v17 }
  0xea   : > { %694 = vmatprep.subr.bf16.mxu0 %v1522_v21  ;;  %1367 = vmatpush3.bf16.msra.mxu1 %v1557_v58 }
  0xeb   : > { %1368 = vmatprep.subr.bf16.mxu1 %v1558_v59 }
  0xec   : > { %594 = vmatmul.mubr.bf16.vlgmr.msra.gmra.mrb[0].mxu0 %v463_v26 }
  0xed   : > { %695 = vmatpush1.bf16.msra.mxu0 %v1520_v25  ;;  %603 = vmatprep.mubr.bf16.mxu0 %v1861_v2 }
  0xee   : > { %696 = vmatprep.subr.bf16.mxu0 %v1525_v27  ;;  %1369 = vmatpush3.bf16.msra.mxu1 %v1559_v60 }
  0xf1   : > { %697 = vmatpush1.bf16.msra.mxu0 %v1523_v29 }
  0xf2   : > { %698 = vmatprep.subr.bf16.mxu0 %v1528_v33 }
  0xf4   : > { %604 = vmatmul.mubr.bf16.gmra.mrb[4].mxu0 %v464_v36 }
  0xf5   : > { %699 = vmatpush1.bf16.msra.mxu0 %v1526_v37  ;;  %726 = vmatprep.mubr.bf16.mxu0 %v1861_v2 }
  0xf6   : > { %700 = vmatprep.subr.bf16.mxu0 %v1531_v38  ;;  %v958_v38 = vstv %s1341_s10 }
  0xf9   : > { %701 = vmatpush1.bf16.msra.mxu0 %v1529_v41  ;;  %v963_v41 = vstv %s956_s15 }
  0xfa   : > { %702 = vmatprep.subr.bf16.mxu0 %v1534_v42 }
  0xfd   : > { %703 = vmatpush1.bf16.msra.mxu0 %v1532_v43 }
  0xfe   : > { %704 = vmatprep.subr.bf16.mxu0 %v1537_v44 }
 0x101   : > { %705 = vmatpush1.bf16.msra.mxu0 %v1535_v45 }
 0x102   : > { %706 = vmatprep.subr.bf16.mxu0 %v1540_v46 }
 0x105   : > { %707 = vmatpush1.bf16.msra.mxu0 %v1538_v47 }
 0x106   : > { %708 = vmatprep.subr.bf16.mxu0 %v1543_v48 }
 0x109   : > { %709 = vmatpush1.bf16.msra.mxu0 %v1541_v49 }
 0x10c   : > { %727 = vmatmul.mubr.bf16.vlgmr.msra.gmra.mrb[0].mxu0 %v445_v52 }
 0x10d   : > { %736 = vmatprep.mubr.bf16.mxu0 %v1861_v2  ;;  %v752_v2 = vrot.slane %v747_v0, %v751_v63 }
 0x114   : > { %737 = vmatmul.mubr.bf16.gmra.mrb[4].mxu0 %v446_v55 }
 0x1df   : > { %v728_v4 = vpop.f32.mrb[0].mxu0 }
 0x1e0   : > { %v759_v5 = vadd.f32 %v752_v2, %v728_v4  ;;  %v730_v6 = vpop.f32.mrb[1].mxu0 }
 0x1e1   : > { %v760_v7 = vadd.f32 %v756_v3, %v730_v6  ;;  %v732_v8 = vpop.f32.mrb[2].mxu0 }
 0x1e2   : > { %v761_v9 = vadd.f32 %v752_v2, %v732_v8  ;;  %v734_v10 = vpop.f32.mrb[3].mxu0  ;;  %v767_v12 = vmax.f32 %v759_v5, 0.0 }
 0x1e3   : > { %v762_v11 = vadd.f32 %v756_v3, %v734_v10  ;;  %v768_v14 = vmax.f32 %v760_v7, 0.0 }
 0x1e4   : > { %v769_v13 = vmax.f32 %v761_v9, 0.0 }
 0x1e5   : > { %v770_v15 = vmax.f32 %v762_v11, 0.0 }
 0x1e6   : > { %v775_v16 = vpack.c.bf16 %v769_v13, %v767_v12 }
 0x1e7   : > { %v738_v17 = vpop.f32.mrb[4].mxu0  ;;  %v776_v20 = vpack.c.bf16 %v770_v15, %v768_v14 }
 0x1e8   : > { %v763_v21 = vadd.f32 %v752_v2, %v738_v17  ;;  %v740_v22 = vpop.f32.mrb[5].mxu0 }
 0x1e9   : > { %v764_v23 = vadd.f32 %v756_v3, %v740_v22  ;;  %v742_v24 = vpop.f32.mrb[6].mxu0  ;;  %939 = vmatprep.mubr.bf16.mxu1 %v776_v20 }
 0x1ea   : > { %v765_v25 = vadd.f32 %v752_v2, %v742_v24  ;;  %v744_v26 = vpop.f32.mrb[7].mxu0  ;;  %940 = vmatmul.mubr.bf16.vlgmr.msra.gmra.mrb[0].mxu1 %v775_v16  ;;  %v771_v28 = vmax.f32 %v763_v21, 0.0 }
 0x1eb   : > { %v766_v27 = vadd.f32 %v756_v3, %v744_v26  ;;  %v772_v32 = vmax.f32 %v764_v23, 0.0 }
 0x1ec   : > { %v773_v29 = vmax.f32 %v765_v25, 0.0  ;;  %v1053_v25 = vand.u32 127, %v749_v61 }
 0x1ed   : > { %v774_v33 = vmax.f32 %v766_v27, 0.0 }
 0x1ee   : > { %v777_v34 = vpack.c.bf16 %v773_v29, %v771_v28  ;;  %vm1055_vm0 = vcmp.eq.s32.totalorder %v1053_v25, 1  ;;  %vm1054_vm1 = vcmp.eq.s32.totalorder %v1053_v25, 0 }
 0x1ef   : > { %v778_v35 = vpack.c.bf16 %v774_v33, %v772_v32 }
 0x1f1   : > { %947 = vmatprep.mubr.bf16.mxu1 %v778_v35 }
 0x1f2   : > { %948 = vmatmul.mubr.bf16.gmra.mrb[4].mxu1 %v777_v34 }
 0x2bd   : > { %v1370_v36 = vpop.f32.mrb[0].mxu1 }
 0x2be   : > { %v1371_v37 = vpop.f32.mrb[1].mxu1 }
 0x2bf   : > { %v1372_v39 = vadd.f32 %v1371_v37, %v1370_v36  ;;  %v1373_v40 = vpop.f32.mrb[2].mxu1 }
 0x2c0   : > { %v1374_v42 = vpop.f32.mrb[3].mxu1 }
 0x2c1   : > { %v959_v43 = vadd.f32 %v1372_v39, %v958_v38  ;;  %v1375_v44 = vadd.f32 %v1374_v42, %v1373_v40 }
 0x2c3   : > { %v964_v45 = vmul.f32 %v963_v41, %v959_v43  ;;  %v960_v46 = vadd.f32 %v1375_v44, %v958_v38 }
 0x2c5   : > { %v968_v47 = vsub.f32 0.0, %v964_v45  ;;  %v965_v48 = vmul.f32 %v963_v41, %v960_v46  ;;  %v1376_v49 = vpop.f32.mrb[4].mxu1 }
 0x2c6   : > { %v1377_v52 = vpop.f32.mrb[5].mxu1 }
 0x2c7   : > { %v972_v55 = vmul.f32 1.442695, %v968_v47  ;;  %v969_v56 = vsub.f32 0.0, %v965_v48  ;;  %v1378_v57 = vadd.f32 %v1377_v52, %v1376_v49  ;;  %v1379_v58 = vpop.f32.mrb[6].mxu1 }
 0x2c8   : > { %v1380_v59 = vpop.f32.mrb[7].mxu1 }
 0x2c9   : > { %1560 = vpow2.f32 %v972_v55  ;;  %v974_v60 = vmul.f32 1.442695, %v969_v56  ;;  %v961_v62 = vadd.f32 %v1378_v57, %v958_v38  ;;  %v1381_v63 = vadd.f32 %v1380_v59, %v1379_v58 }
 0x2cb   : > { %1562 = vpow2.f32 %v974_v60  ;;  %v966_v0 = vmul.f32 %v963_v41, %v961_v62  ;;  %v962_v1 = vadd.f32 %v1381_v63, %v958_v38 }
 0x2cd   : > { %v970_v2 = vsub.f32 0.0, %v966_v0  ;;  %v967_v3 = vmul.f32 %v963_v41, %v962_v1 }
 0x2cf   : > { %v976_v4 = vmul.f32 1.442695, %v970_v2  ;;  %v971_v5 = vsub.f32 0.0, %v967_v3 }
 0x2d1   : > { %1564 = vpow2.f32 %v976_v4  ;;  %v978_v6 = vmul.f32 1.442695, %v971_v5 }
 0x2d3   : > { %v1561_v7 = vpop.eup %1560  ;;  %1566 = vpow2.f32 %v978_v6 }
 0x2d4   : > { %v980_v8 = vadd.f32 1.0, %v1561_v7 }
 0x2d5   : > { %v1563_v9 = vpop.eup %1562 }
 0x2d6   : > { %1568 = vrcp.f32 %v980_v8  ;;  %v981_v10 = vadd.f32 1.0, %v1563_v9 }
 0x2d8   : > { %1570 = vrcp.f32 %v981_v10 }
 0x2db   : > { %v1565_v11 = vpop.eup %1564 }
 0x2dc   : > { %v982_v12 = vadd.f32 1.0, %v1565_v11 }
 0x2dd   : > { %v1567_v13 = vpop.eup %1566 }
 0x2de   : > { %1572 = vrcp.f32 %v982_v12  ;;  %v983_v14 = vadd.f32 1.0, %v1567_v13 }
 0x2e0   : > { %v1569_v15 = vpop.eup %1568  ;;  %1574 = vrcp.f32 %v983_v14 }
 0x2e1   : > { %998 = vperm.xlu0 %1494, %v1569_v15   ;;  %v992_v20 = vsub.f32 1.0, %v1569_v15 }
 0x2e2   : > { %v1571_v16 = vpop.eup %1570 }
 0x2e3   : > { %v993_v17 = vsub.f32 1.0, %v1571_v16 }
 0x2e5   : > { %1027 = vperm.xlu1 %1495, %v993_v17   ;;  %1003 = vperm.xlu0 %1494, %v1571_v16  }
 0x2e8   : > { %v1573_v21 = vpop.eup %1572 }
 0x2e9   : > { %1022 = vperm.xlu0 %1494, %v992_v20   ;;  %1008 = vperm.xlu1 %1495, %v1573_v21   ;;  %v994_v22 = vsub.f32 1.0, %v1573_v21 }
 0x2ea   : > { %v1575_v23 = vpop.eup %1574 }
 0x2eb   : > { %v995_v24 = vsub.f32 1.0, %v1575_v23 }
 0x2ed   : > { %1013 = vperm.xlu1 %1495, %v1575_v23   ;;  %1032 = vperm.xlu0 %1494, %v994_v22  }
 0x2f1   : > { %1037 = vperm.xlu1 %1495, %v995_v24  }
 0x360   : > { %v999_v26 = vpop.permute.xlu0 %998 }
 0x361   : > { %v1016_v37 = vmul.f32 %v999_v26, %v2215_v50 }
 0x364   : > { %v1028_v27 = vpop.permute.xlu1 %1027  ;;  %v1004_v28 = vpop.permute.xlu0 %1003 }
 0x365   : > { %v1041_v29 = vmul.f32 %v1028_v27, %v2200_v19  ;;  %v1057_v32 = vsel %vm1055_vm0, %v1028_v27, 0.0  ;;  %v1017_v33 = vmul.f32 %v1004_v28, %v2218_v51 }
 0x366   : > { %v1061_v34 = vsel %vm1054_vm1, %v1004_v28, %v1057_v32 }
 0x367   : > { %v1045_v35 = vadd.f32 %v1041_v29, %v1017_v33  ;;  %1065 = vst [vmem:[%s2241_s2 + $0x8] sm:$0xff] %v1061_v34 }
 0x368   : > { %v1023_v61 = vpop.permute.xlu0 %1022  ;;  %v1009_v36 = vpop.permute.xlu1 %1008 }
 0x369   : > { %1049 = vst [vmem:[%s2246_s3 + $0x8] sm:$0xff] %v1045_v35  ;;  %v1040_v19 = vmul.f32 %v1023_v61, %v2197_v18  ;;  %v1056_v51 = vsel %vm1055_vm0, %v1023_v61, 0.0  ;;  %v1018_v41 = vmul.f32 %v1009_v36, %v2224_v53 }
 0x36a   : > { %v1060_v38 = vsel %vm1054_vm1, %v999_v26, %v1056_v51 }
 0x36b   : > { %v1044_v39 = vadd.f32 %v1040_v19, %v1016_v37  ;;  %1064 = vst [vmem:[%s2241_s2] sm:$0xff] %v1060_v38 }
 0x36c   : > { %v1014_v40 = vpop.permute.xlu1 %1013  ;;  %v1033_v50 = vpop.permute.xlu0 %1032 }
 0x36d   : > { %1048 = vst [vmem:[%s2246_s3] sm:$0xff] %v1044_v39  ;;  %v1042_v42 = vmul.f32 %v1033_v50, %v2205_v30  ;;  %v1058_v43 = vsel %vm1055_vm0, %v1033_v50, 0.0  ;;  %v1019_v53 = vmul.f32 %v1014_v40, %v2227_v54 }
 0x36e   : > { %v1062_v18 = vsel %vm1054_vm1, %v1009_v36, %v1058_v43 }
 0x36f   : > { %v1046_v44 = vadd.f32 %v1042_v42, %v1018_v41  ;;  %1066 = vst [vmem:[%s2241_s2 + $0x10] sm:$0xff] %v1062_v18 }
 0x370   : > { %v1038_v45 = vpop.permute.xlu1 %1037 }
 0x371   : > { %1050 = vst [vmem:[%s2246_s3 + $0x10] sm:$0xff] %v1046_v44  ;;  %v1043_v30 = vmul.f32 %v1038_v45, %v2208_v31  ;;  %v1059_v46 = vsel %vm1055_vm0, %v1038_v45, 0.0 }
 0x372   : > { %v1063_v47 = vsel %vm1054_vm1, %v1014_v40, %v1059_v46 }
 0x373   : > { %v1047_v48 = vadd.f32 %v1043_v30, %v1019_v53  ;;  %1067 = vst [vmem:[%s2241_s2 + $0x18] sm:$0xff] %v1063_v47 }
 0x374   : > { %1748 = shalt.err (!%p1745_p12)
}
 0x375   : > { %s1749_s10 = scalar_lea.hbm %s2271_s9, 512  ;;  %s1753_s21 = scalar_lea.hbm %s2363_s8, 1024 }
 0x376   : > { %p1750_p11 = scmp.ne.s32.totalorder %s2271_s9, %s1749_s10  ;;  %p1754_p9 = scmp.lt.u32.totalorder %s2271_s9, %s2363_s8 }
 0x377   : > { %p1755_p4 = scmp.lt.u32.totalorder %s1753_s21, %s1749_s10  ;;  %p1757_p7 = scmp.lt.u32.totalorder %s1749_s10, %s2271_s9 }
 0x378   : > { %p1751_p10 = pnand %p1750_p11, %p2068_p2 }
 0x379   : > { %p1756_p8 = por %p1755_p4, %p1754_p9 }
 0x37a   : > { %p1752_p5 = pneg %p1751_p10 }
 0x37b   : > { %p1758_p13 = por %p1757_p7, %p1756_p8 }
 0x37d   : > { %p1759_p0 = pnand %p1758_p13, %p1752_p5 }
 0x37f   : > { %1762 = shalt.err (!%p1759_p0)
}
 0x380   : > { %s1863_s24 = smov 128   ;;  %s1864_s17 = smov 8   ;;  %1051 = vst [vmem:[%s2246_s3 + $0x18] sm:$0xff] %v1047_v48 }
 0x381   : > { %1411 = dma.vmem_to_hbm [thread:$0]  (%p2068_p2), %s2261_s18, 512, %s2271_s9, %s1074_s13, %s1863_s24, %s1863_s24, %s1864_s17  }
 0x382   : > { %s1069_s19 = scalar_lea.sflag [#allocation4], %s2160_s26  ;;  %s1763_s22 = scalar_lea.vmem %s2273_s25, 512 }
 0x383   : > { %p1764_p1 = scmp.ne.s32.totalorder %s2273_s25, %s1763_s22  ;;  %s1865_s11 = smov [#allocation13]  }
 0x384   : > { %s1767_s23 = sshll.u32 %s1865_s11, 4  ;;  %s1768_s23 = int_to_ptr.vmem [resolvable:$false] %s1767_s23 }
 0x385   : > { %p1765_p6 = pnand %p1764_p1, %p2068_p2  ;;  %s1769_s10 = scalar_lea.vmem %s1768_s23, 1024 }
 0x386   : > { %p1770_p12 = scmp.lt.s32.totalorder %s2273_s25, %s1768_s23  ;;  %p1771_p11 = scmp.lt.s32.totalorder %s1769_s10, %s1763_s22 }
 0x387   : > { %p1766_p3 = pneg %p1765_p6 }
 0x388   : > { %p1772_p10 = por %p1771_p11, %p1770_p12 }
 0x38a   : > { %p1773_p5 = pnand %p1772_p10, %p1766_p3 }
 0x38c   : > { %1776 = shalt.err (!%p1773_p5)
}
 0x38d   : > { %s1777_s3 = scalar_lea.hbm %s2280_s12, 512  ;;  %s1781_s13 = scalar_lea.hbm %s2362_s7, 1024 }
 0x38e   : > { %p1778_p9 = scmp.ne.s32.totalorder %s2280_s12, %s1777_s3  ;;  %p1782_p7 = scmp.lt.u32.totalorder %s2280_s12, %s2362_s7 }
 0x38f   : > { %p1783_p13 = scmp.lt.u32.totalorder %s1781_s13, %s1777_s3  ;;  %p1785_p1 = scmp.lt.u32.totalorder %s1777_s3, %s2280_s12 }
 0x390   : > { %p1779_p4 = pnand %p1778_p9, %p2068_p2 }
 0x391   : > { %p1784_p0 = por %p1783_p13, %p1782_p7 }
 0x392   : > { %p1780_p8 = pneg %p1779_p4 }
 0x393   : > { %p1786_p6 = por %p1785_p1, %p1784_p0 }
 0x395   : > { %p1787_p3 = pnand %p1786_p6, %p1780_p8 }
 0x397   : > { %1790 = shalt.err (!%p1787_p3)
}
 0x398   : > { %1410 = dma.vmem_to_hbm [thread:$0]  (%p2068_p2), %s2273_s25, 512, %s2280_s12, %s1069_s19, %s1863_s24, %s1863_s24, %s1864_s17  }
 0x399 PF: > { %s2399_s21 = sld [smem:[#allocation23_spill]]  ;;  %s2400_s14 = sld [smem:[#allocation24_spill]] }
 0x39a   : > { %p2402_p11 = scmp.ge.s32.totalorder %s1849_s30, 2 }
 0x39f   : > { %s1118_s0 = sand.u32 1, %s2399_s21   ;;  %p2401_p12 = scmp.ne.s32.totalorder %s2400_s14, 0 }
 0x3a0   : > { %s1119_s22 = scalar_lea.sflag [#allocation4], %s1118_s0 }
 0x3a1   : > { %p1435_p10 = pnand %p2402_p11, %p2401_p12 }
 0x3a3   : > { %1828 = dma.done.wait (!%p1435_p10), %s1119_s22, 512  }
 0x3a4   : > { %1830 = vsyncadd (!%p1435_p10), %s1119_s22, 4294966784  ;;  %s1128_s27 = scalar_lea.sflag [#allocation15], %s1118_s0 }
 0x3a5   : > { %1832 = dma.done.wait (!%p1435_p10), %s1128_s27, 512  }
 0x3a6   : > { %1834 = vsyncadd (!%p1435_p10), %s1128_s27, 4294966784  ;;  %p30_p2 = scmp.ge.s32.totalorder %s2055_s20, 4   ;;  %s2403_s27 = smov %s1841_s28 }
 0x3a7   : > { %s2404_s28 = smov %s1845_s29  ;;  %s2405_s29 = smov %s2064_s16 }
 0x3a8   : > { %s2406_s30 = smov %s2055_s20  ;;  %32 = sbr.rel (!%p30_p2) target bundleno = 15 (0xf), region = 140 }
 0x3af   :  { %1133 = vsyncpa [#allocation3], 1 }
 0x3b0   :  { %1135 = vsyncpa [#allocation3 + $0x1], 1 }
 0x3b1   :  { %1136 = vsyncpa [#allocation7], 1 }
 0x3b2   :  { %1138 = vsyncpa [#allocation7 + $0x1], 1 }
 0x3b3   :  { %1139 = vsyncpa [#allocation10], 1 }
 0x3b4   :  { %1140 = vsyncpa [#allocation4], 1 }
 0x3b5   :  { %1142 = vsyncpa [#allocation4 + $0x1], 1 }
 0x3b6   :  { %1143 = vsyncpa [#allocation15], 1 }
 0x3b7   :  { %1145 = vsyncpa [#allocation15 + $0x1], 1 }
 0x3b8   :  { %1146 = vsyncpa [#allocation5], 1 }
 0x3b9   :  { %1148 = vsyncpa [#allocation5 + $0x1], 1 }

</bundles_post_ra>
